<compile_context>
chip_gen: v5e
topology: v5e:2x2
jax: 0.10.0
libtpu: 0.0.40
codegen_flags: <defaults>
</compile_context>

<pallas_src>
import jax
import jax.numpy as jnp
from jax.experimental import pallas as pl
from jax.experimental.pallas import tpu as pltpu

PACK = 4  # rows folded into the lane dim (4*32=128 input lanes, 4*16=64 out lanes)


def mlp_kernel(x_ref, w1_ref, b1_ref, w2_ref, b2_ref, wo_ref, bo_ref, o_ref):
    """Fused 3-layer MLP on one packed row-tile.

    x_ref:  (TMp, PACK*D_in)         packed activations in their native dtype (f32)
    w*_ref: (PACK*D_in, PACK*D_out)  bf16 block-diagonal weights (VMEM-resident)
    b*_ref: (1, PACK*D_out)          f32 tiled biases
    o_ref:  (TMp, PACK*out_size)     bf16 packed output tile
    """
    # Cast in-VMEM (no separate HBM f32->bf16 prepass in the wrapper).
    x = x_ref[...].astype(w1_ref.dtype)

    # Layer 1: Linear + ReLU (MXU bf16 matmul, f32 accumulation, f32 elementwise).
    h = jnp.dot(x, w1_ref[...], preferred_element_type=jnp.float32) + b1_ref[...]
    h = jnp.maximum(h, 0.0)

    # Layer 2: Linear + ReLU.
    h = jnp.dot(h.astype(w2_ref.dtype), w2_ref[...],
                preferred_element_type=jnp.float32) + b2_ref[...]
    h = jnp.maximum(h, 0.0)

    # Output layer: Linear, no activation (matches out_layer in the module).
    out = jnp.dot(h.astype(wo_ref.dtype), wo_ref[...],
                  preferred_element_type=jnp.float32) + bo_ref[...]
    o_ref[...] = out.astype(o_ref.dtype)


def _round_up(a, m):
    return (a + m - 1) // m * m


def pack_mlp_params(params, *, pack=PACK, compute_dtype=jnp.bfloat16):
    """Expand weights to block-diagonal (kron) packed form ONCE; reuse per call.

    Packed matmul x_packed @ kron(I_pack, W) is exactly the per-row matmul x @ W
    with `pack` consecutive rows folded into the lane dimension.
    """
    w1, b1, w2, b2, wo, bo = params
    eye = jnp.eye(pack, dtype=compute_dtype)
    w1p = jnp.kron(eye, w1.astype(compute_dtype))   # (P*d_in, P*h1)
    w2p = jnp.kron(eye, w2.astype(compute_dtype))   # (P*h1,  P*h2)
    wop = jnp.kron(eye, wo.astype(compute_dtype))   # (P*h2,  P*d_out)
    b1p = jnp.tile(b1.astype(jnp.float32), (1, pack))
    b2p = jnp.tile(b2.astype(jnp.float32), (1, pack))
    bop = jnp.tile(bo.astype(jnp.float32), (1, pack))
    return (w1p, b1p, w2p, b2p, wop, bop)


def _pick_row_tile(n_rows, target, align):
    """Row tile that is a multiple of `align`, close to `target`, and divides
    n_rows exactly when a cheap divisor exists (so no padded copy of x)."""
    if n_rows <= target:
        return _round_up(max(n_rows, align), align)
    if n_rows % align == 0:
        units = n_rows // align
        max_k = max(target // align, 1)
        lo = max(max_k // 4, 1)                 # don't shrink tiles below target/4
        for k in range(max_k, lo - 1, -1):
            if units % k == 0:
                return k * align                # exact divisor -> zero padding
    return _round_up(target, align)


def mlp_forward(x, packed_params, *, row_tile=8192, out_dtype=jnp.bfloat16):
    """x: [B, T, D_in] -> [B, T, out_size] (out_dtype). Hot path is the Pallas kernel."""
    w1p, b1p, w2p, b2p, wop, bop = packed_params
    B, T, d_in = x.shape
    n_rows = B * T

    P = w1p.shape[0] // d_in
    assert w1p.shape[0] == d_in * P, "packed weights inconsistent with input dim"
    h1 = w1p.shape[1] // P
    h2 = w2p.shape[1] // P
    d_out = wop.shape[1] // P
    # Packed input / hidden widths must be lane multiples of 128 (true for
    # 32/64/64 with PACK=4).  The 64-wide packed output is legal because the
    # output block spans the full array width; its masked store is negligible.
    assert (d_in * P) % 128 == 0 and (h1 * P) % 128 == 0 and (h2 * P) % 128 == 0

    align = 8 * P                               # keeps packed tiles (8,128)-aligned
    row_tile = _pick_row_tile(n_rows, row_tile, align)
    n_pad = _round_up(n_rows, row_tile)

    # v7x megacore: if one tile would cover everything, split into 2 grid steps
    # (when alignment allows, so no extra padding) so both TensorCores get work.
    if n_pad == row_tile and row_tile % (2 * align) == 0:
        row_tile //= 2

    x2d = x.reshape(n_rows, d_in)
    if n_pad != n_rows:                         # trace-time branch; pad only if needed
        x2d = jnp.pad(x2d, ((0, n_pad - n_rows), (0, 0)))
    # Row-major contiguous => pure view change: fold P rows into the lane dim.
    xp = x2d.reshape(n_pad // P, d_in * P)

    tmp = row_tile // P                         # packed rows per grid step
    grid = (n_pad // row_tile,)

    outp = pl.pallas_call(
        mlp_kernel,
        out_shape=jax.ShapeDtypeStruct((n_pad // P, d_out * P), out_dtype),
        grid_spec=pltpu.PrefetchScalarGridSpec(
            num_scalar_prefetch=0,
            grid=grid,
            in_specs=[
                pl.BlockSpec((tmp, d_in * P), lambda i: (i, 0)),      # x (streamed, f32)
                pl.BlockSpec((d_in * P, h1 * P), lambda i: (0, 0)),   # w1 (resident)
                pl.BlockSpec((1, h1 * P), lambda i: (0, 0)),          # b1
                pl.BlockSpec((h1 * P, h2 * P), lambda i: (0, 0)),     # w2 (resident)
                pl.BlockSpec((1, h2 * P), lambda i: (0, 0)),          # b2
                pl.BlockSpec((h2 * P, d_out * P), lambda i: (0, 0)),  # wo (resident)
                pl.BlockSpec((1, d_out * P), lambda i: (0, 0)),       # bo
            ],
            out_specs=pl.BlockSpec((tmp, d_out * P), lambda i: (i, 0)),
        ),
        compiler_params=pltpu.CompilerParams(
            dimension_semantics=("parallel",),
            # Explicit budget: above v5e's 16 MiB default scoped limit, with
            # headroom on v7x's 64 MiB physical VMEM (~11 MiB used at tmp=2048).
            vmem_limit_bytes=32 * 1024 * 1024,
        ),
    )(xp, w1p, b1p, w2p, b2p, wop, bop)

    # Undo packing / padding (row-major contiguous reshape + slice).
    out2d = outp.reshape(n_pad, d_out)[:n_rows]
    return out2d.reshape(B, T, d_out)


# ----------------------------- init + reference -----------------------------------

def _glorot_uniform(key, shape, gain):
    fan_in, fan_out = shape
    limit = gain * jnp.sqrt(6.0 / (fan_in + fan_out))
    return jax.random.uniform(key, shape, jnp.float32, -limit, limit)


def _orthogonal(key, shape, scale):
    # shape = (in, out); build an orthogonal matrix via QR.
    n = max(shape)
    a = jax.random.normal(key, (n, n), jnp.float32)
    q, r = jnp.linalg.qr(a)
    q = q * jnp.sign(jnp.diag(r))  # deterministic sign
    return scale * q[: shape[0], : shape[1]]


def init_mlp_params(key, input_dim, units_list, out_size, out_scale=1.0):
    """Parameter init mirroring the module's __init__.

    Hidden layers: glorot_uniform with relu gain (sqrt(2)), zero bias.
    Output layer: orthogonal with gain=out_scale, zero bias.
    Weights are stored [in, out].
    """
    gain = jnp.sqrt(2.0)  # calculate_scale('relu')
    keys = jax.random.split(key, len(units_list) + 1)
    params = []
    prev = input_dim
    for i, u in enumerate(units_list):
        w = _glorot_uniform(keys[i], (prev, u), gain)
        b = jnp.zeros((1, u), jnp.float32)
        params += [w, b]
        prev = u
    wo = _orthogonal(keys[-1], (prev, out_size), out_scale)
    bo = jnp.zeros((1, out_size), jnp.float32)
    params += [wo, bo]
    return tuple(params)


def mlp_reference(x, params, compute_dtype=jnp.bfloat16):
    """Pure-JAX reference emulating the kernel's bf16-in / f32-accumulate matmuls."""
    w1, b1, w2, b2, wo, bo = params

    def mm(a, w):
        return jnp.dot(a.astype(compute_dtype), w.astype(compute_dtype),
                       preferred_element_type=jnp.float32)

    h = jnp.maximum(mm(x, w1) + b1[0], 0.0)
    h = jnp.maximum(mm(h, w2) + b2[0], 0.0)
    return mm(h, wo) + bo[0]


if __name__ == "__main__":
    # Small shapes consistent with the module's forward: x of shape [B, T, input_dim]
    input_dim = 32
    units_list = [64, 64]
    out_size = 16

    key = jax.random.PRNGKey(0)
    k_x, k_x2, k_p = jax.random.split(key, 3)

    params = init_mlp_params(k_p, input_dim, units_list, out_size)
    packed = pack_mlp_params(params)          # built once, reused across calls

    run = jax.jit(mlp_forward)

    # Primary small check (B=2, T=8): single-tile path.
    B, T = 2, 8
    x = jax.random.normal(k_x, (B, T, input_dim), jnp.float32)
    out = jax.block_until_ready(run(x, packed))
    ref = mlp_reference(x, params)
    assert out.shape == (B, T, out_size), out.shape
    assert jnp.allclose(out.astype(jnp.float32), ref, atol=2e-2, rtol=2e-2), \
        "mismatch vs reference (small)"

    # Secondary check (B=4, T=64): exercises the 2-step grid / megacore-split path.
    B2, T2 = 4, 64
    x2 = jax.random.normal(k_x2, (B2, T2, input_dim), jnp.float32)
    out2 = jax.block_until_ready(run(x2, packed))
    ref2 = mlp_reference(x2, params)
    assert out2.shape == (B2, T2, out_size), out2.shape
    assert jnp.allclose(out2.astype(jnp.float32), ref2, atol=2e-2, rtol=2e-2), \
        "mismatch vs reference (multi-tile)"

    # TODO(synk): rnn_type='lstm'/'gru' branch (RNNLayer) not implemented —
    # sequential recurrence is a separate kernel; only the rnn=None path is covered.
    print("KERNEL_OK")
</pallas_src>

<mosaic_0001>
module attributes {stable_mosaic.version = 11 : i64} {
  func.func @mlp_kernel(%arg0: i32, %arg1: memref<8x128xf32, #tpu.memory_space<vmem>>, %arg2: memref<128x256xbf16, #tpu.memory_space<vmem>>, %arg3: memref<1x256xf32, #tpu.memory_space<vmem>>, %arg4: memref<256x256xbf16, #tpu.memory_space<vmem>>, %arg5: memref<1x256xf32, #tpu.memory_space<vmem>>, %arg6: memref<256x64xbf16, #tpu.memory_space<vmem>>, %arg7: memref<1x64xf32, #tpu.memory_space<vmem>>, %arg8: memref<8x64xbf16, #tpu.memory_space<vmem>>) attributes {dimension_semantics = [#tpu.dimension_semantics<parallel>], iteration_bounds = array<i64: 1>, scalar_prefetch = 0 : i64, scratch_operands = 0 : i64, tpu.core_type = #tpu.core_type<tc>, window_params = [{transform_indices = @transform_0, window_bounds = array<i64: 8, 128>}, {pipeline_mode = #tpu.pipeline_mode<synchronous>, transform_indices = @transform_1, window_bounds = array<i64: 128, 256>}, {pipeline_mode = #tpu.pipeline_mode<synchronous>, transform_indices = @transform_2, window_bounds = array<i64: 1, 256>}, {pipeline_mode = #tpu.pipeline_mode<synchronous>, transform_indices = @transform_3, window_bounds = array<i64: 256, 256>}, {pipeline_mode = #tpu.pipeline_mode<synchronous>, transform_indices = @transform_4, window_bounds = array<i64: 1, 256>}, {pipeline_mode = #tpu.pipeline_mode<synchronous>, transform_indices = @transform_5, window_bounds = array<i64: 256, 64>}, {pipeline_mode = #tpu.pipeline_mode<synchronous>, transform_indices = @transform_6, window_bounds = array<i64: 1, 64>}, {transform_indices = @transform_7, window_bounds = array<i64: 8, 64>}]} {
    %c0 = arith.constant 0 : index
    %c0_0 = arith.constant 0 : index
    %0 = vector.load %arg1[%c0, %c0_0] : memref<8x128xf32, #tpu.memory_space<vmem>>, vector<8x128xf32>
    %1 = arith.truncf %0 : vector<8x128xf32> to vector<8x128xbf16>
    %c0_1 = arith.constant 0 : index
    %c0_2 = arith.constant 0 : index
    %2 = vector.load %arg2[%c0_1, %c0_2] : memref<128x256xbf16, #tpu.memory_space<vmem>>, vector<128x256xbf16>
    %cst = arith.constant dense<0.000000e+00> : vector<8x256xf32>
    %3 = tpu.matmul %1, %2, %cst {dimension_numbers = #tpu.dot_dimension_numbers<[1], [0], [0], [1], [0, 0, 1, 1], [], []>} : vector<8x128xbf16>, vector<128x256xbf16>, vector<8x256xf32> -> vector<8x256xf32>
    %c0_3 = arith.constant 0 : index
    %c0_4 = arith.constant 0 : index
    %4 = vector.load %arg3[%c0_3, %c0_4] : memref<1x256xf32, #tpu.memory_space<vmem>>, vector<1x256xf32>
    %5 = vector.broadcast %4 : vector<1x256xf32> to vector<8x256xf32>
    %6 = arith.addf %3, %5 : vector<8x256xf32>
    %cst_5 = arith.constant 0.000000e+00 : f32
    %7 = vector.broadcast %cst_5 : f32 to vector<8x256xf32>
    %8 = arith.maximumf %6, %7 : vector<8x256xf32>
    %9 = arith.truncf %8 : vector<8x256xf32> to vector<8x256xbf16>
    %c0_6 = arith.constant 0 : index
    %c0_7 = arith.constant 0 : index
    %10 = vector.load %arg4[%c0_6, %c0_7] : memref<256x256xbf16, #tpu.memory_space<vmem>>, vector<256x256xbf16>
    %cst_8 = arith.constant dense<0.000000e+00> : vector<8x256xf32>
    %11 = tpu.matmul %9, %10, %cst_8 {dimension_numbers = #tpu.dot_dimension_numbers<[1], [0], [0], [1], [0, 0, 1, 1], [], []>} : vector<8x256xbf16>, vector<256x256xbf16>, vector<8x256xf32> -> vector<8x256xf32>
    %c0_9 = arith.constant 0 : index
    %c0_10 = arith.constant 0 : index
    %12 = vector.load %arg5[%c0_9, %c0_10] : memref<1x256xf32, #tpu.memory_space<vmem>>, vector<1x256xf32>
    %13 = vector.broadcast %12 : vector<1x256xf32> to vector<8x256xf32>
    %14 = arith.addf %11, %13 : vector<8x256xf32>
    %cst_11 = arith.constant 0.000000e+00 : f32
    %15 = vector.broadcast %cst_11 : f32 to vector<8x256xf32>
    %16 = arith.maximumf %14, %15 : vector<8x256xf32>
    %17 = arith.truncf %16 : vector<8x256xf32> to vector<8x256xbf16>
    %c0_12 = arith.constant 0 : index
    %c0_13 = arith.constant 0 : index
    %18 = vector.load %arg6[%c0_12, %c0_13] : memref<256x64xbf16, #tpu.memory_space<vmem>>, vector<256x64xbf16>
    %cst_14 = arith.constant dense<0.000000e+00> : vector<8x64xf32>
    %19 = tpu.matmul %17, %18, %cst_14 {dimension_numbers = #tpu.dot_dimension_numbers<[1], [0], [0], [1], [0, 0, 1, 1], [], []>} : vector<8x256xbf16>, vector<256x64xbf16>, vector<8x64xf32> -> vector<8x64xf32>
    %c0_15 = arith.constant 0 : index
    %c0_16 = arith.constant 0 : index
    %20 = vector.load %arg7[%c0_15, %c0_16] : memref<1x64xf32, #tpu.memory_space<vmem>>, vector<1x64xf32>
    %21 = vector.broadcast %20 : vector<1x64xf32> to vector<8x64xf32>
    %22 = arith.addf %19, %21 : vector<8x64xf32>
    %23 = arith.truncf %22 : vector<8x64xf32> to vector<8x64xbf16>
    %c0_17 = arith.constant 0 : index
    %c0_18 = arith.constant 0 : index
    %24 = vector.load %arg8[%c0_17, %c0_18] : memref<8x64xbf16, #tpu.memory_space<vmem>>, vector<8x64xbf16>
    tpu.vector_store %arg8[%c0_17, %c0_18], %23 {strides = array<i32>} : memref<8x64xbf16, #tpu.memory_space<vmem>>, vector<8x64xbf16>,
    return
  }
  func.func @transform_0(%arg0: i32) -> (i32, i32) {
    %c0_i32 = arith.constant 0 : i32
    %c0_i32_0 = arith.constant 0 : i32
    return %arg0, %c0_i32 : i32, i32
  }
  func.func @transform_1(%arg0: i32) -> (i32, i32) {
    %c0_i32 = arith.constant 0 : i32
    %c0_i32_0 = arith.constant 0 : i32
    %c0_i32_1 = arith.constant 0 : i32
    return %c0_i32, %c0_i32_0 : i32, i32
  }
  func.func @transform_2(%arg0: i32) -> (i32, i32) {
    %c0_i32 = arith.constant 0 : i32
    %c0_i32_0 = arith.constant 0 : i32
    %c0_i32_1 = arith.constant 0 : i32
    return %c0_i32, %c0_i32_0 : i32, i32
  }
  func.func @transform_3(%arg0: i32) -> (i32, i32) {
    %c0_i32 = arith.constant 0 : i32
    %c0_i32_0 = arith.constant 0 : i32
    %c0_i32_1 = arith.constant 0 : i32
    return %c0_i32, %c0_i32_0 : i32, i32
  }
  func.func @transform_4(%arg0: i32) -> (i32, i32) {
    %c0_i32 = arith.constant 0 : i32
    %c0_i32_0 = arith.constant 0 : i32
    %c0_i32_1 = arith.constant 0 : i32
    return %c0_i32, %c0_i32_0 : i32, i32
  }
  func.func @transform_5(%arg0: i32) -> (i32, i32) {
    %c0_i32 = arith.constant 0 : i32
    %c0_i32_0 = arith.constant 0 : i32
    %c0_i32_1 = arith.constant 0 : i32
    return %c0_i32, %c0_i32_0 : i32, i32
  }
  func.func @transform_6(%arg0: i32) -> (i32, i32) {
    %c0_i32 = arith.constant 0 : i32
    %c0_i32_0 = arith.constant 0 : i32
    %c0_i32_1 = arith.constant 0 : i32
    return %c0_i32, %c0_i32_0 : i32, i32
  }
  func.func @transform_7(%arg0: i32) -> (i32, i32) {
    %c0_i32 = arith.constant 0 : i32
    %c0_i32_0 = arith.constant 0 : i32
    return %arg0, %c0_i32 : i32, i32
  }
}

</mosaic_0001>

<bundles_post_ra>
// kernel: mlp_forward.1
= control target key start
LH: loop header
LB: loop body
LE: loop exit
PB: predicated region body
PF: predicated region fallthrough
CT: control target
= control target key end

     0   :  { %12 = vsyncpa [#allocation3], 0  ;;  %s946_s27 = smov [#allocation2]   ;;  %s947_s29 = smov 128   ;;  %s1151_s0 = inlined_call_operand.vmem [shape: f32[8,128], index: 0, kind: input, shape index: {}]   ;;  %s1152_s1 = inlined_call_operand.vmem [shape: bf16[128,256], index: 1, kind: input, shape index: {}]   ;;  %s1153_s2 = inlined_call_operand.vmem [shape: f32[1,256], index: 2, kind: input, shape index: {}]   ;;  %s1154_s3 = inlined_call_operand.hbm [shape: bf16[256,256], index: 3, kind: input, shape index: {}]   ;;  %s1155_s4 = inlined_call_operand.vmem [shape: f32[1,256], index: 4, kind: input, shape index: {}]   ;;  %s1156_s5 = inlined_call_operand.vmem [shape: bf16[256,64], index: 5, kind: input, shape index: {}]   ;;  %s1157_s6 = inlined_call_operand.vmem [shape: f32[1,64], index: 6, kind: input, shape index: {}]   ;;  %s1158_s7 = inlined_call_operand.vmem [shape: bf16[8,64], index: 7, kind: output, shape index: {}]  }
   0x1   :  { %s23_s26 = sshll.u32 %s1154_s3, 4  ;;  %s25_s28 = sshll.u32 %s946_s27, 4  ;;  %s24_s26 = int_to_ptr.hbm [resolvable:$true] %s23_s26  ;;  %s26_s28 = int_to_ptr.vmem [resolvable:$true] %s25_s28 }
   0x2   :  { %s948_s30 = smov 8  }
   0x3   :  { %31 = dma.hbm_to_vmem [thread:$0]  %s24_s26, 4096, %s26_s28, [#allocation3], %s947_s29, %s947_s29, %s948_s30  }
   0x4   :  { %944 = dma.done.wait [#allocation3], 4096  }
   0x5   :  { %945 = vsyncadd [#allocation3], 4294963200  ;;  %v654_v0 = vld [vmem:[%s1152_s1 + $0x70] sm:$0xf]  ;;  %v867_v1 = vld [vmem:[%s1152_s1 + $0x74] sm:$0xf0] }
   0x6   :  { %v866_v2 = vld [vmem:[%s1152_s1 + $0x74] sm:$0xf]  ;;  %v655_v3 = vor.u32 %v867_v1, %v654_v0  ;;  %v656_v4 = vld [vmem:[%s1152_s1 + $0x78] sm:$0xf0]  ;;  %v646_v5 = vld [vmem:[%s1152_s1 + $0x60] sm:$0xf] }
   0x7   :  { %v865_v6 = vld [vmem:[%s1152_s1 + $0x64] sm:$0xf0]  ;;  %v659_v7 = vor.u32 %v866_v2, %v656_v4  ;;  %v864_v8 = vld [vmem:[%s1152_s1 + $0x64] sm:$0xf]  ;;  %v648_v9 = vld [vmem:[%s1152_s1 + $0x68] sm:$0xf0] }
   0x8   :  { %146 = vmatpush.bf16.msra.mxu0 %v655_v3  ;;  %v647_v10 = vor.u32 %v865_v6, %v646_v5  ;;  %v651_v11 = vor.u32 %v864_v8, %v648_v9  ;;  %v638_v12 = vld [vmem:[%s1152_s1 + $0x50] sm:$0xf]  ;;  %v863_v13 = vld [vmem:[%s1152_s1 + $0x54] sm:$0xf0]  ;;  %v862_v14 = vld [vmem:[%s1152_s1 + $0x54] sm:$0xf] }
   0x9   :  { %159 = vmatpush.bf16.msra.mxu1 %v659_v7  ;;  %v640_v15 = vld [vmem:[%s1152_s1 + $0x58] sm:$0xf0]  ;;  %v639_v16 = vor.u32 %v863_v13, %v638_v12  ;;  %v630_v18 = vld [vmem:[%s1152_s1 + $0x40] sm:$0xf]  ;;  %v861_v19 = vld [vmem:[%s1152_s1 + $0x44] sm:$0xf0] }
   0xa   :  { %v643_v17 = vor.u32 %v862_v14, %v640_v15  ;;  %v860_v20 = vld [vmem:[%s1152_s1 + $0x44] sm:$0xf]  ;;  %v632_v21 = vld [vmem:[%s1152_s1 + $0x48] sm:$0xf0]  ;;  %v631_v22 = vor.u32 %v861_v19, %v630_v18  ;;  %v718_v23 = vld [vmem:[#allocation2 + $0x70] sm:$0xf] }
   0xb   :  { %v883_v24 = vld [vmem:[#allocation2 + $0x74] sm:$0xf0]  ;;  %v782_v25 = vld [vmem:[#allocation2 + $0xf0] sm:$0xf]  ;;  %v635_v26 = vor.u32 %v860_v20, %v632_v21  ;;  %v858_v31 = vld [vmem:[%s1152_s1 + $0x34] sm:$0xf] }
   0xc   :  { %147 = vmatpush.bf16.msra.mxu0 %v647_v10  ;;  %v622_v27 = vld [vmem:[%s1152_s1 + $0x30] sm:$0xf]  ;;  %v859_v28 = vld [vmem:[%s1152_s1 + $0x34] sm:$0xf0]  ;;  %v719_v29 = vor.u32 %v883_v24, %v718_v23  ;;  %v624_v32 = vld [vmem:[%s1152_s1 + $0x38] sm:$0xf0] }
   0xd   :  { %160 = vmatpush.bf16.msra.mxu1 %v651_v11  ;;  %v899_v30 = vld [vmem:[#allocation2 + $0xf4] sm:$0xf0]  ;;  %v710_v34 = vld [vmem:[#allocation2 + $0x60] sm:$0xf]  ;;  %v881_v35 = vld [vmem:[#allocation2 + $0x64] sm:$0xf0]  ;;  %v623_v38 = vor.u32 %v859_v28, %v622_v27  ;;  %v627_v43 = vor.u32 %v858_v31, %v624_v32 }
   0xe   :  { %v783_v33 = vor.u32 %v899_v30, %v782_v25  ;;  %374 = vmatpush.bf16.msra.mxu2 %v719_v29  ;;  %v774_v36 = vld [vmem:[#allocation2 + $0xe0] sm:$0xf]  ;;  %v897_v37 = vld [vmem:[#allocation2 + $0xe4] sm:$0xf0]  ;;  %v711_v41 = vor.u32 %v881_v35, %v710_v34  ;;  %v856_v44 = vld [vmem:[%s1152_s1 + $0x24] sm:$0xf] }
   0xf   :  { %v614_v39 = vld [vmem:[%s1152_s1 + $0x20] sm:$0xf]  ;;  %v857_v40 = vld [vmem:[%s1152_s1 + $0x24] sm:$0xf0]  ;;  %v775_v42 = vor.u32 %v897_v37, %v774_v36  ;;  %v702_v45 = vld [vmem:[#allocation2 + $0x50] sm:$0xf] }
  0x10   :  { %148 = vmatpush.bf16.msra.mxu0 %v639_v16  ;;  %387 = vmatpush.bf16.msra.mxu3 %v783_v33  ;;  %v879_v46 = vld [vmem:[#allocation2 + $0x54] sm:$0xf0]  ;;  %v616_v47 = vld [vmem:[%s1152_s1 + $0x28] sm:$0xf0]  ;;  %v766_v48 = vld [vmem:[#allocation2 + $0xd0] sm:$0xf]  ;;  %v615_v51 = vor.u32 %v857_v40, %v614_v39 }
  0x11   :  { %161 = vmatpush.bf16.msra.mxu1 %v643_v17  ;;  %v895_v49 = vld [vmem:[#allocation2 + $0xd4] sm:$0xf0]  ;;  %v703_v50 = vor.u32 %v879_v46, %v702_v45  ;;  %v606_v52 = vld [vmem:[%s1152_s1 + $0x10] sm:$0xf]  ;;  %v694_v54 = vld [vmem:[#allocation2 + $0x40] sm:$0xf]  ;;  %v619_v56 = vor.u32 %v856_v44, %v616_v47 }
  0x12   :  { %375 = vmatpush.bf16.msra.mxu2 %v711_v41  ;;  %v767_v53 = vor.u32 %v895_v49, %v766_v48  ;;  %v877_v55 = vld [vmem:[#allocation2 + $0x44] sm:$0xf0]  ;;  %v855_v57 = vld [vmem:[%s1152_s1 + $0x14] sm:$0xf0]  ;;  %v758_v58 = vld [vmem:[#allocation2 + $0xc0] sm:$0xf] }
  0x13   :  { %v893_v59 = vld [vmem:[#allocation2 + $0xc4] sm:$0xf0]  ;;  %v854_v60 = vld [vmem:[%s1152_s1 + $0x14] sm:$0xf]  ;;  %v608_v61 = vld [vmem:[%s1152_s1 + $0x18] sm:$0xf0]  ;;  %v695_v63 = vor.u32 %v877_v55, %v694_v54  ;;  %v607_v0 = vor.u32 %v855_v57, %v606_v52 }
  0x14   :  { %149 = vmatpush.bf16.msra.mxu0 %v631_v22  ;;  %388 = vmatpush.bf16.msra.mxu3 %v775_v42  ;;  %v598_v62 = vld [vmem:[%s1152_s1] sm:$0xf]  ;;  %v853_v1 = vld [vmem:[%s1152_s1 + $0x4] sm:$0xf0]  ;;  %v759_v2 = vor.u32 %v893_v59, %v758_v58  ;;  %v686_v3 = vld [vmem:[#allocation2 + $0x30] sm:$0xf]  ;;  %v611_v5 = vor.u32 %v854_v60, %v608_v61 }
  0x15   :  { %162 = vmatpush.bf16.msra.mxu1 %v635_v26  ;;  %v875_v4 = vld [vmem:[#allocation2 + $0x34] sm:$0xf0]  ;;  %v852_v6 = vld [vmem:[%s1152_s1 + $0x4] sm:$0xf]  ;;  %v750_v7 = vld [vmem:[#allocation2 + $0xb0] sm:$0xf]  ;;  %v599_v16 = vor.u32 %v853_v1, %v598_v62 }
  0x16   :  { %376 = vmatpush.bf16.msra.mxu2 %v703_v50  ;;  %v891_v8 = vld [vmem:[#allocation2 + $0xb4] sm:$0xf0]  ;;  %v600_v9 = vld [vmem:[%s1152_s1 + $0x8] sm:$0xf0]  ;;  %v882_v10 = vld [vmem:[#allocation2 + $0x74] sm:$0xf]  ;;  %v687_v15 = vor.u32 %v875_v4, %v686_v3 }
  0x17   :  { %v720_v11 = vld [vmem:[#allocation2 + $0x78] sm:$0xf0]  ;;  %v42_v12 = vld [vmem:[%s1151_s0] sm:$0xff]  ;;  %v898_v13 = vld [vmem:[#allocation2 + $0xf4] sm:$0xf]  ;;  %v751_v17 = vor.u32 %v891_v8, %v750_v7  ;;  %v603_v20 = vor.u32 %v852_v6, %v600_v9  ;;  %vm589_vm0 = vcmask 519168  }
  0x18   :  { %150 = vmatpush.bf16.msra.mxu0 %v623_v38  ;;  %389 = vmatpush.bf16.msra.mxu3 %v767_v53  ;;  %v784_v14 = vld [vmem:[#allocation2 + $0xf8] sm:$0xf0]  ;;  %v678_v18 = vld [vmem:[#allocation2 + $0x20] sm:$0xf]  ;;  %v873_v19 = vld [vmem:[#allocation2 + $0x24] sm:$0xf0]  ;;  %v723_v21 = vor.u32 %v882_v10, %v720_v11  ;;  %v43_v27 = vpack.c.bf16 %v42_v12, %v42_v12 }
  0x19   :  { %163 = vmatpush.bf16.msra.mxu1 %v627_v43  ;;  %v742_v22 = vld [vmem:[#allocation2 + $0xa0] sm:$0xf]  ;;  %v889_v23 = vld [vmem:[#allocation2 + $0xa4] sm:$0xf0]  ;;  %v787_v24 = vor.u32 %v898_v13, %v784_v14  ;;  %v880_v25 = vld [vmem:[#allocation2 + $0x64] sm:$0xf]  ;;  %v679_v30 = vor.u32 %v873_v19, %v678_v18 }
  0x1a   :  { %377 = vmatpush.bf16.msra.mxu2 %v695_v63  ;;  %v712_v26 = vld [vmem:[#allocation2 + $0x68] sm:$0xf0]  ;;  %v896_v28 = vld [vmem:[#allocation2 + $0xe4] sm:$0xf]  ;;  %v743_v31 = vor.u32 %v889_v23, %v742_v22  ;;  %v878_v34 = vld [vmem:[#allocation2 + $0x54] sm:$0xf] }
  0x1b   :  { %v776_v29 = vld [vmem:[#allocation2 + $0xe8] sm:$0xf0]  ;;  %v715_v32 = vor.u32 %v880_v25, %v712_v26  ;;  %v704_v35 = vld [vmem:[#allocation2 + $0x58] sm:$0xf0]  ;;  %v894_v36 = vld [vmem:[#allocation2 + $0xd4] sm:$0xf] }
  0x1c   :  { %151 = vmatpush.bf16.msra.mxu0 %v615_v51  ;;  %390 = vmatpush.bf16.msra.mxu3 %v759_v2  ;;  %v779_v33 = vor.u32 %v896_v28, %v776_v29  ;;  %v768_v37 = vld [vmem:[#allocation2 + $0xd8] sm:$0xf0]  ;;  %v707_v38 = vor.u32 %v878_v34, %v704_v35  ;;  %v876_v40 = vld [vmem:[#allocation2 + $0x44] sm:$0xf]  ;;  %v696_v41 = vld [vmem:[#allocation2 + $0x48] sm:$0xf0] }
  0x1d   :  { %164 = vmatpush.bf16.msra.mxu1 %v619_v56  ;;  %v771_v39 = vor.u32 %v894_v36, %v768_v37  ;;  %v892_v42 = vld [vmem:[#allocation2 + $0xc4] sm:$0xf]  ;;  %v760_v43 = vld [vmem:[#allocation2 + $0xc8] sm:$0xf0]  ;;  %v699_v44 = vor.u32 %v876_v40, %v696_v41  ;;  %v874_v46 = vld [vmem:[#allocation2 + $0x34] sm:$0xf] }
  0x1e   :  { %378 = vmatpush.bf16.msra.mxu2 %v687_v15  ;;  %v763_v45 = vor.u32 %v892_v42, %v760_v43  ;;  %v688_v47 = vld [vmem:[#allocation2 + $0x38] sm:$0xf0]  ;;  %v890_v48 = vld [vmem:[#allocation2 + $0xb4] sm:$0xf]  ;;  %v872_v52 = vld [vmem:[#allocation2 + $0x24] sm:$0xf] }
  0x1f   :  { %v752_v49 = vld [vmem:[#allocation2 + $0xb8] sm:$0xf0]  ;;  %v691_v50 = vor.u32 %v874_v46, %v688_v47  ;;  %v680_v53 = vld [vmem:[#allocation2 + $0x28] sm:$0xf0]  ;;  %v888_v54 = vld [vmem:[#allocation2 + $0xa4] sm:$0xf] }
  0x20   :  { %152 = vmatpush.bf16.msra.mxu0 %v607_v0  ;;  %391 = vmatpush.bf16.msra.mxu3 %v751_v17  ;;  %v755_v51 = vor.u32 %v890_v48, %v752_v49  ;;  %v744_v55 = vld [vmem:[#allocation2 + $0xa8] sm:$0xf0]  ;;  %v683_v56 = vor.u32 %v872_v52, %v680_v53  ;;  %v670_v58 = vld [vmem:[#allocation2 + $0x10] sm:$0xf]  ;;  %v871_v59 = vld [vmem:[#allocation2 + $0x14] sm:$0xf0] }
  0x21   :  { %165 = vmatpush.bf16.msra.mxu1 %v611_v5  ;;  %v747_v57 = vor.u32 %v888_v54, %v744_v55  ;;  %v734_v60 = vld [vmem:[#allocation2 + $0x90] sm:$0xf]  ;;  %v671_v61 = vor.u32 %v871_v59, %v670_v58  ;;  %v887_v62 = vld [vmem:[#allocation2 + $0x94] sm:$0xf0]  ;;  %v870_v63 = vld [vmem:[#allocation2 + $0x14] sm:$0xf] }
  0x22   :  { %379 = vmatpush.bf16.msra.mxu2 %v679_v30  ;;  %v672_v0 = vld [vmem:[#allocation2 + $0x18] sm:$0xf0]  ;;  %v735_v1 = vor.u32 %v887_v62, %v734_v60  ;;  %v886_v3 = vld [vmem:[#allocation2 + $0x94] sm:$0xf]  ;;  %v662_v6 = vld [vmem:[#allocation2] sm:$0xf] }
  0x23   :  { %v675_v2 = vor.u32 %v870_v63, %v672_v0  ;;  %v736_v4 = vld [vmem:[#allocation2 + $0x98] sm:$0xf0]  ;;  %v869_v7 = vld [vmem:[#allocation2 + $0x4] sm:$0xf0]  ;;  %v726_v8 = vld [vmem:[#allocation2 + $0x80] sm:$0xf] }
  0x24   :  { %153 = vmatpush.bf16.msra.mxu0 %v599_v16  ;;  %392 = vmatpush.bf16.msra.mxu3 %v743_v31  ;;  %v739_v5 = vor.u32 %v886_v3, %v736_v4  ;;  %v663_v9 = vor.u32 %v869_v7, %v662_v6  ;;  %v885_v10 = vld [vmem:[#allocation2 + $0x84] sm:$0xf0]  ;;  %v868_v11 = vld [vmem:[#allocation2 + $0x4] sm:$0xf]  ;;  %v664_v12 = vld [vmem:[#allocation2 + $0x8] sm:$0xf0] }
  0x25   :  { %166 = vmatpush.bf16.msra.mxu1 %v603_v20  ;;  %v727_v13 = vor.u32 %v885_v10, %v726_v8  ;;  %v667_v14 = vor.u32 %v868_v11, %v664_v12  ;;  %v884_v15 = vld [vmem:[#allocation2 + $0x84] sm:$0xf]  ;;  %v728_v16 = vld [vmem:[#allocation2 + $0x88] sm:$0xf0]  ;;  %v915_v18 = vld [vmem:[%s1156_s5 + $0x78] sm:$0xff] }
  0x26   :  { %380 = vmatpush.bf16.msra.mxu2 %v671_v61  ;;  %v731_v17 = vor.u32 %v884_v15, %v728_v16  ;;  %v907_v19 = vld [vmem:[%s1156_s5 + $0x38] sm:$0xff]  ;;  %v914_v20 = vld [vmem:[%s1156_s5 + $0x70] sm:$0xff]  ;;  %v913_v22 = vld [vmem:[%s1156_s5 + $0x68] sm:$0xff] }
  0x27   :  { %154 = vmatmul.bf16.vlgmr.msra.gmra.mxu0 %v43_v27  ;;  %v905_v23 = vld [vmem:[%s1156_s5 + $0x28] sm:$0xff]  ;;  %v904_v25 = vld [vmem:[%s1156_s5 + $0x20] sm:$0xff]  ;;  %v911_v26 = vld [vmem:[%s1156_s5 + $0x58] sm:$0xff] }
  0x28   :  { %400 = vmatpush.bf16.msrb.mxu0 %v723_v21  ;;  %167 = vmatmul.bf16.vlgmr.msra.gmra.mxu1 %v43_v27  ;;  %v906_v21 = vld [vmem:[%s1156_s5 + $0x30] sm:$0xff]  ;;  %v60_v27 = vld [vmem:[%s1153_s2] sm:$0x3]  ;;  %v903_v41 = vld [vmem:[%s1156_s5 + $0x18] sm:$0xff] }
  0x29   :  { %413 = vmatpush.bf16.msrb.mxu1 %v787_v24  ;;  %393 = vmatpush.bf16.msra.mxu3 %v735_v1  ;;  %v912_v24 = vld [vmem:[%s1156_s5 + $0x60] sm:$0xff]  ;;  %v910_v28 = vld [vmem:[%s1156_s5 + $0x50] sm:$0xff]  ;;  %v62_v29 = vperm.slane %v60_v27, 0  ;;  %v63_v30 = vperm.slane %v60_v27, 1  ;;  %v909_v42 = vld [vmem:[%s1156_s5 + $0x48] sm:$0xff] }
  0x2a   :  { %381 = vmatpush.bf16.msra.mxu2 %v663_v9  ;;  %v902_v43 = vld [vmem:[%s1156_s5 + $0x10] sm:$0xff]  ;;  %v900_v46 = vld [vmem:[%s1156_s5] sm:$0xff] }
  0x2b   :  { %v208_v47 = vld [vmem:[%s1155_s4] sm:$0x3] }
  0x2c   :  { %401 = vmatpush.bf16.msrb.mxu0 %v715_v32  ;;  %v211_v48 = vperm.slane %v208_v47, 1  ;;  %v210_v53 = vperm.slane %v208_v47, 0  ;;  %v919_v3 = vld [vmem:[%s1157_s6] ss:$0 sm:$0xff] }
  0x2d   :  { %414 = vmatpush.bf16.msrb.mxu1 %v779_v33  ;;  %394 = vmatpush.bf16.msra.mxu3 %v727_v13 }
  0x2e   :  { %562 = vmatpush.bf16.msrb.mxu2 %v907_v19 }
  0x30   :  { %402 = vmatpush.bf16.msrb.mxu0 %v707_v38 }
  0x31   :  { %415 = vmatpush.bf16.msrb.mxu1 %v771_v39  ;;  %575 = vmatpush.bf16.msrb.mxu3 %v915_v18 }
  0x32   :  { %563 = vmatpush.bf16.msrb.mxu2 %v906_v21 }
  0x34   :  { %403 = vmatpush.bf16.msrb.mxu0 %v699_v44  ;;  %v908_v44 = vld [vmem:[%s1156_s5 + $0x40] sm:$0xff] }
  0x35   :  { %416 = vmatpush.bf16.msrb.mxu1 %v763_v45  ;;  %576 = vmatpush.bf16.msrb.mxu3 %v914_v20  ;;  %v901_v45 = vld [vmem:[%s1156_s5 + $0x8] sm:$0xff] }
  0x36   :  { %564 = vmatpush.bf16.msrb.mxu2 %v905_v23 }
  0x38   :  { %404 = vmatpush.bf16.msrb.mxu0 %v691_v50 }
  0x39   :  { %417 = vmatpush.bf16.msrb.mxu1 %v755_v51  ;;  %577 = vmatpush.bf16.msrb.mxu3 %v913_v22 }
  0x3a   :  { %565 = vmatpush.bf16.msrb.mxu2 %v904_v25 }
  0x3c   :  { %405 = vmatpush.bf16.msrb.mxu0 %v683_v56 }
  0x3d   :  { %418 = vmatpush.bf16.msrb.mxu1 %v747_v57  ;;  %578 = vmatpush.bf16.msrb.mxu3 %v912_v24 }
  0x3e   :  { %566 = vmatpush.bf16.msrb.mxu2 %v903_v41 }
  0x40   :  { %406 = vmatpush.bf16.msrb.mxu0 %v675_v2 }
  0x41   :  { %419 = vmatpush.bf16.msrb.mxu1 %v739_v5  ;;  %579 = vmatpush.bf16.msrb.mxu3 %v911_v26 }
  0x42   :  { %567 = vmatpush.bf16.msrb.mxu2 %v902_v43 }
  0x44   :  { %407 = vmatpush.bf16.msrb.mxu0 %v667_v14 }
  0x45   :  { %420 = vmatpush.bf16.msrb.mxu1 %v731_v17  ;;  %580 = vmatpush.bf16.msrb.mxu3 %v910_v28 }
  0x46   :  { %568 = vmatpush.bf16.msrb.mxu2 %v901_v45 }
  0x49   :  { %581 = vmatpush.bf16.msrb.mxu3 %v909_v42 }
  0x4a   :  { %569 = vmatpush.bf16.msrb.mxu2 %v900_v46 }
  0x4d   :  { %582 = vmatpush.bf16.msrb.mxu3 %v908_v44 }
  0xa4   :  { %v155_v31 = vpop.f32.mrf.mxu0 }
  0xa5   :  { %v156_v32 = vadd.f32 %v155_v31, %v62_v29  ;;  %v168_v33 = vpop.f32.mrf.mxu1 }
  0xa6   :  { %v169_v34 = vadd.f32 %v168_v33, %v63_v30 }
  0xa7   :  { %v172_v35 = vmax.f32 %v156_v32, 0.0 }
  0xa8   :  { %v173_v36 = vmax.f32 %v169_v34, 0.0 }
  0xa9   :  { %v174_v37 = vpack.c.bf16 %v172_v35, %v172_v35 }
  0xaa   :  { %v175_v38 = vpack.c.bf16 %v173_v36, %v173_v36 }
  0xab   :  { %382 = vmatmul.bf16.vlgmr.msra.gmra.mxu2 %v174_v37  ;;  %408 = vmatmul.bf16.vlgmr.msrb.gmra.mxu0 %v174_v37 }
  0xac   :  { %395 = vmatmul.bf16.vlgmr.msra.gmra.mxu3 %v175_v38  ;;  %421 = vmatmul.bf16.vlgmr.msrb.gmra.mxu1 %v175_v38  ;;  %v157_v39 = vpop.f32.mrf.mxu0 }
  0xad   :  { %v170_v40 = vpop.f32.mrf.mxu1 }
 0x128   :  { %v409_v49 = vpop.f32.mrf.mxu0 }
 0x129   :  { %v410_v50 = vadd.f32 %v409_v49, %v211_v48  ;;  %v422_v51 = vpop.f32.mrf.mxu1 }
 0x12b   :  { %v423_v52 = vadd.f32 %v422_v51, %v410_v50 }
 0x12d   :  { %v427_v54 = vmax.f32 %v423_v52, 0.0 }
 0x12e   :  { %v383_v55 = vpop.f32.mrf.mxu2 }
 0x12f   :  { %v429_v56 = vpack.c.bf16 %v427_v54, %v427_v54  ;;  %v384_v57 = vadd.f32 %v383_v55, %v210_v53  ;;  %v396_v58 = vpop.f32.mrf.mxu3 }
 0x130   :  { %v411_v59 = vpop.f32.mrf.mxu0 }
 0x131   :  { %v397_v60 = vadd.f32 %v396_v58, %v384_v57  ;;  %v424_v61 = vpop.f32.mrf.mxu1  ;;  %583 = vmatmul.bf16.vlgmr.msrb.gmra.mxu3 %v429_v56 }
 0x133   :  { %v426_v62 = vmax.f32 %v397_v60, 0.0 }
 0x135   :  { %v428_v63 = vpack.c.bf16 %v426_v62, %v426_v62 }
 0x136   :  { %v385_v0 = vpop.f32.mrf.mxu2 }
 0x137   :  { %v398_v1 = vpop.f32.mrf.mxu3  ;;  %570 = vmatmul.bf16.vlgmr.msrb.gmra.mxu2 %v428_v63 }
 0x1b4   :  { %v584_v2 = vpop.f32.mrf.mxu3 }
 0x1ba   :  { %v571_v4 = vpop.f32.mrf.mxu2 }
 0x1bb   :  { %v572_v5 = vadd.f32 %v919_v3, %v571_v4 }
 0x1bc   :  { %v586_v6 = vpop.f32.mrf.mxu3 }
 0x1bd   :  { %v585_v7 = vadd.f32 %v584_v2, %v572_v5 }
 0x1bf   :  { %v588_v8 = vpack.c.bf16 %v585_v7, %v585_v7 }
 0x1c1   :  { %590 = vst.msk [vmem:[%s1158_s7] sm:$0xf] %vm589_vm0, %v588_v8 }
 0x1c2   :  { %v573_v9 = vpop.f32.mrf.mxu2 }
 0x1c3   :  { %595 = vsyncpa [#allocation3], 1 }

</bundles_post_ra>
